<compile_context>
chip_gen: v6e
topology: v6e:2x2x1
jax: 0.10.0
libtpu: 0.0.40
codegen_flags: <defaults>
</compile_context>

<pallas_src>
import jax
import jax.numpy as jnp
from jax import lax
from jax.experimental import pallas as pl
from jax.experimental.pallas import tpu as pltpu


def _conv_mm_kernel(p_ref, w_ref, b_ref, o_ref):
    # p_ref: (tm, K)     bf16 im2col patch tile
    # w_ref: (K, Npad)   bf16 weights (N zero-padded to a multiple of 128)
    # b_ref: (1, Npad)   f32 bias row
    # o_ref: (tm, Npad)  f32 output tile -> lane-dense stores
    acc = jnp.dot(p_ref[...], w_ref[...], preferred_element_type=jnp.float32)
    acc = acc + b_ref[...]
    o_ref[...] = jnp.maximum(acc, 0.0).astype(o_ref.dtype)


def _choose_grid_steps(M, K, Npad, *, min_steps=2, vmem_budget_bytes=24 << 20):
    """Pick the grid step count along M.

    Wants: >= min_steps (so a v7x megacore gets work on both TCs), M-tile a
    multiple of 8 sublanes that divides M evenly, and the double-buffered
    per-step tiles comfortably inside a conservative VMEM budget (safe for
    v7x's 64 MiB physical / 32 MiB scoped default).
    """
    # per-M-row VMEM: double-buffered bf16 patch row + double-buffered f32 out row
    per_row_bytes = 2 * (K * 2) + 2 * (Npad * 4)
    best = 1
    for steps in range(1, max(1, M // 8) + 1):
        if M % steps:
            continue
        tm = M // steps
        if tm % 8:
            continue
        best = steps
        if steps >= min_steps and tm * per_row_bytes <= vmem_budget_bytes:
            return steps
    return best


def conv3x3_relu_pallas(patches, weight, bias):
    """patches: [M, K] bf16, weight: [K, Npad] bf16, bias: [Npad] f32 -> [M, Npad] f32."""
    M, K = patches.shape
    Kw, Npad = weight.shape
    assert K == Kw
    assert Npad % 128 == 0, "pad N to a multiple of 128 for lane-dense stores"

    steps = _choose_grid_steps(M, K, Npad)
    tm = M // steps
    bias2d = bias.reshape(1, Npad)

    return pl.pallas_call(
        _conv_mm_kernel,
        out_shape=jax.ShapeDtypeStruct((M, Npad), jnp.float32),
        grid_spec=pltpu.PrefetchScalarGridSpec(
            num_scalar_prefetch=0,
            grid=(steps,),
            in_specs=[
                pl.BlockSpec((tm, K), lambda i: (i, 0)),      # patch tile
                pl.BlockSpec((K, Npad), lambda i: (0, 0)),    # full weights (resident)
                pl.BlockSpec((1, Npad), lambda i: (0, 0)),    # bias row (VMEM)
            ],
            out_specs=pl.BlockSpec((tm, Npad), lambda i: (i, 0)),
        ),
        compiler_params=pltpu.CompilerParams(
            dimension_semantics=("parallel",),
        ),
    )(patches, weight, bias2d)


@jax.jit
def model_exp_00_forward(x_nchw, weight_oihw, bias):
    """Forward of model_exp_00 with the synthetic tl_block.

    x_nchw:      [B, Cin, H, W]
    weight_oihw: [N, Cin, 3, 3]   (PyTorch Conv2d layout)
    bias:        [N]
    returns:     [B, W, H, N]  == torch.transpose(tl_block(x), 1, 3)
    """
    B, Cin, H, W = x_nchw.shape
    Nout = weight_oihw.shape[0]
    kh = kw = 3
    K = Cin * kh * kw
    Npad = ((Nout + 127) // 128) * 128

    # [B, Cin, H, W] -> [B, W, H, Cin] (small 1x copy), bf16 for the MXU.
    x_t = jnp.transpose(x_nchw, (0, 3, 2, 1)).astype(jnp.bfloat16)

    # im2col, channel-last directly (no transpose of the 9x-expanded tensor).
    # Feature ordering along K is (Cin, k_along_W, k_along_H).
    patches = lax.conv_general_dilated_patches(
        x_t,
        filter_shape=(kh, kw),
        window_strides=(1, 1),
        padding="SAME",
        dimension_numbers=("NHWC", "HWIO", "NHWC"),
    )                                               # [B, W, H, K]
    patches = patches.reshape(B * W * H, K)         # rows ordered (b, w, h)

    # Conv weight [N, Cin, kh, kw] -> [K, Npad] matching the (Cin, kw, kh)
    # patch feature order above; zero-pad N -> Npad for lane-dense stores.
    w_mat = jnp.transpose(weight_oihw, (1, 3, 2, 0)).reshape(K, Nout)
    w_mat = jnp.pad(w_mat, ((0, 0), (0, Npad - Nout))).astype(jnp.bfloat16)
    bias_pad = jnp.pad(bias, (0, Npad - Nout)).astype(jnp.float32)

    out_flat = conv3x3_relu_pallas(patches, w_mat, bias_pad)   # [B*W*H, Npad] f32
    # Rows are already (b, w, h)-ordered, so this reshape IS the
    # torch.transpose(NCHW_out, 1, 3) layout — no extra XLA transpose copy.
    out = out_flat[:, :Nout].reshape(B, W, H, Nout)
    return out


if __name__ == "__main__":
    # Small shapes consistent with the module: batch=2, in channels=4,
    # spatial 16x16 (in_width=16), N (tl_block output channels)=32.
    B, Cin, H, W = 2, 4, 16, 16
    Nout = 32

    key = jax.random.PRNGKey(0)
    kx, kw_, kb = jax.random.split(key, 3)
    x = jax.random.normal(kx, (B, Cin, H, W), dtype=jnp.float32)
    weight = jax.random.normal(kw_, (Nout, Cin, 3, 3), dtype=jnp.float32) * 0.1
    bias = jax.random.normal(kb, (Nout,), dtype=jnp.float32) * 0.1

    out = model_exp_00_forward(x, weight, bias)
    out = jax.block_until_ready(out)

    assert out.shape == (B, W, H, Nout), out.shape

    # Cross-check the Pallas conv path against a lax.conv reference computed
    # with the same bf16 input precision / f32 accumulation.  This guards the
    # K-ordering assumption of conv_general_dilated_patches.
    ref = lax.conv_general_dilated(
        x.astype(jnp.bfloat16), weight.astype(jnp.bfloat16),
        window_strides=(1, 1), padding="SAME",
        dimension_numbers=("NCHW", "OIHW", "NCHW"),
        preferred_element_type=jnp.float32,
    ) + bias.reshape(1, Nout, 1, 1)
    ref = jnp.maximum(ref, 0.0)
    ref = jnp.transpose(ref, (0, 3, 2, 1))  # torch.transpose(out, 1, 3)
    assert jnp.allclose(out, ref, atol=1e-2, rtol=1e-2), \
        float(jnp.max(jnp.abs(out - ref)))

    print("KERNEL_OK")
</pallas_src>

<mosaic_0001>
module attributes {stable_mosaic.version = 11 : i64} {
  func.func @_conv_mm_kernel(%arg0: i32, %arg1: memref<256x36xbf16, #tpu.memory_space<vmem>>, %arg2: memref<36x128xbf16, #tpu.memory_space<vmem>>, %arg3: memref<1x128xf32, #tpu.memory_space<vmem>>, %arg4: memref<256x128xf32, #tpu.memory_space<vmem>>) attributes {dimension_semantics = [#tpu.dimension_semantics<parallel>], iteration_bounds = array<i64: 2>, scalar_prefetch = 0 : i64, scratch_operands = 0 : i64, tpu.core_type = #tpu.core_type<tc>, window_params = [{transform_indices = @transform_0, window_bounds = array<i64: 256, 36>}, {pipeline_mode = #tpu.pipeline_mode<synchronous>, transform_indices = @transform_1, window_bounds = array<i64: 36, 128>}, {pipeline_mode = #tpu.pipeline_mode<synchronous>, transform_indices = @transform_2, window_bounds = array<i64: 1, 128>}, {transform_indices = @transform_3, window_bounds = array<i64: 256, 128>}]} {
    %c0 = arith.constant 0 : index
    %c0_0 = arith.constant 0 : index
    %0 = vector.load %arg1[%c0, %c0_0] : memref<256x36xbf16, #tpu.memory_space<vmem>>, vector<256x36xbf16>
    %c0_1 = arith.constant 0 : index
    %c0_2 = arith.constant 0 : index
    %1 = vector.load %arg2[%c0_1, %c0_2] : memref<36x128xbf16, #tpu.memory_space<vmem>>, vector<36x128xbf16>
    %cst = arith.constant dense<0.000000e+00> : vector<256x128xf32>
    %2 = tpu.matmul %0, %1, %cst {dimension_numbers = #tpu.dot_dimension_numbers<[1], [0], [0], [1], [0, 0, 1, 1], [], []>} : vector<256x36xbf16>, vector<36x128xbf16>, vector<256x128xf32> -> vector<256x128xf32>
    %c0_3 = arith.constant 0 : index
    %c0_4 = arith.constant 0 : index
    %3 = vector.load %arg3[%c0_3, %c0_4] : memref<1x128xf32, #tpu.memory_space<vmem>>, vector<1x128xf32>
    %4 = vector.broadcast %3 : vector<1x128xf32> to vector<256x128xf32>
    %5 = arith.addf %2, %4 : vector<256x128xf32>
    %cst_5 = arith.constant 0.000000e+00 : f32
    %6 = vector.broadcast %cst_5 : f32 to vector<256x128xf32>
    %7 = arith.maximumf %5, %6 : vector<256x128xf32>
    %c0_6 = arith.constant 0 : index
    %c0_7 = arith.constant 0 : index
    %8 = vector.load %arg4[%c0_6, %c0_7] : memref<256x128xf32, #tpu.memory_space<vmem>>, vector<256x128xf32>
    tpu.vector_store %arg4[%c0_6, %c0_7], %7 {strides = array<i32>} : memref<256x128xf32, #tpu.memory_space<vmem>>, vector<256x128xf32>,
    return
  }
  func.func @transform_0(%arg0: i32) -> (i32, i32) {
    %c0_i32 = arith.constant 0 : i32
    %c0_i32_0 = arith.constant 0 : i32
    return %arg0, %c0_i32 : i32, i32
  }
  func.func @transform_1(%arg0: i32) -> (i32, i32) {
    %c0_i32 = arith.constant 0 : i32
    %c0_i32_0 = arith.constant 0 : i32
    %c0_i32_1 = arith.constant 0 : i32
    return %c0_i32, %c0_i32_0 : i32, i32
  }
  func.func @transform_2(%arg0: i32) -> (i32, i32) {
    %c0_i32 = arith.constant 0 : i32
    %c0_i32_0 = arith.constant 0 : i32
    %c0_i32_1 = arith.constant 0 : i32
    return %c0_i32, %c0_i32_0 : i32, i32
  }
  func.func @transform_3(%arg0: i32) -> (i32, i32) {
    %c0_i32 = arith.constant 0 : i32
    %c0_i32_0 = arith.constant 0 : i32
    return %arg0, %c0_i32 : i32, i32
  }
}

</mosaic_0001>

<bundles_post_ra>
// kernel: model_exp_00_forward.1
= control target key start
LH: loop header
LB: loop body
LE: loop exit
PB: predicated region body
PF: predicated region fallthrough
CT: control target
= control target key end

     0   :  { %8 = vsyncpa [#allocation3], 0  ;;  %s1145_s0 = inlined_call_operand.vmem [shape: bf16[512,36], index: 0, kind: input, shape index: {}]   ;;  %s1146_s1 = inlined_call_operand.vmem [shape: bf16[36,128], index: 1, kind: input, shape index: {}]   ;;  %s1147_s2 = inlined_call_operand.vmem [shape: f32[1,128], index: 2, kind: input, shape index: {}]   ;;  %s1148_s3 = inlined_call_operand.hbm [shape: f32[512,128], index: 3, kind: output, shape index: {}]  }
   0x1   :  { %10 = vsyncpa [#allocation3 + $0x1], 0  ;;  %s925_s12 = smov 0   ;;  %s927_s13 = smov 0  }
   0x2   :  { %s929_s14 = smov 0   ;;  %s931_s15 = smov 0  }
   0x3 LB: > { %s946_s16 = sadd.s32 4294967295, %s900_s15   ;;  %s666_s17 = sadd.s32 4294967294, %s900_s15   ;;  %s900_s15 = sphi %s931_s15, %s1154_s15   ;;  %s896_s14 = sphi %s929_s14, %s1153_s14   ;;  %s892_s13 = sphi %s927_s13, %s1152_s13   ;;  %s888_s12 = sphi %s925_s12, %s1151_s12  }
   0x4   : > { %s950_s18 = sadd.s32 1, %s900_s15   ;;  %s91_s19 = sadd.s32 1, %s896_s14 }
   0x5   : > { %s88_s20 = ssub.s32 %s900_s15, %s950_s18  ;;  %p101_p0 = scmp.ne.s32.totalorder %s896_s14, %s892_s13 }
   0x6   : > { %p89_p1 = scmp.eq.s32.totalorder %s88_s20, 0  ;;  %p102_p2 = scmp.eq.s32.totalorder %s946_s16, 1 }
   0x7   : > { %p107_p3 = scmp.ne.s32.totalorder %s892_s13, %s888_s12  ;;  %p108_p4 = scmp.eq.s32.totalorder %s666_s17, 1 }
   0x8   : > { %s961_s21 = scalar_select %p89_p1, %s896_s14, %s91_s19  }
   0x9   : > { %p963_p5 = por %p102_p2, %p101_p0  ;;  %p967_p6 = por %p108_p4, %p107_p3 }
   0xa   : > { %p669_p7 = scmp.ge.s32.totalorder %s900_s15, 1  ;;  %p141_p8 = scmp.lt.s32.totalorder %s900_s15, 3 }
   0xc   : > { %p142_p9 = pnand %p669_p7, %p141_p8 }
   0xd   : > { %s671_s28 = sshll.u32 (!%p142_p9), %s946_s16, 5  ;;  %s162_s8 = sand.u32 (!%p142_p9), 1, %s892_s13  }
   0xe   : > { %145 = sbr.rel (%p142_p9) target bundleno = 273 (0x111), region = 32  ;;  %p166_p10 = scmp.lt.s32.totalorder (!%p142_p9), %s671_s28, 63 }
   0xf   : > { %s670_s11 = sshll.u32 (!%p142_p9), %s162_s8, 8  ;;  %s714_s19 = sshll.u32 (!%p142_p9), %s946_s16, 12 }
  0x10   : > { %s1032_s17 = scalar_lea.vmem (!%p142_p9), [#allocation2], %s670_s11  ;;  %s1095_s26 = scalar_lea.hbm (!%p142_p9), %s1148_s3, %s714_s19 }
  0x11   : > { %s604_s20 = sshll.u32 (!%p142_p9), %s1032_s17, 4  ;;  %s1105_s16 = scalar_lea.sflag (!%p142_p9), [#allocation3], %s162_s8  ;;  %s1097_s20 = int_to_ptr.vmem [resolvable:$true] %s604_s20 }
  0x12   : > { %s840_s27 = scalar_lea.vmem (!%p142_p9), %s1097_s20, 4096 }
  0x13   : > { %v821_v0 = vld [vmem:[%s1146_s1 + $0x10] ss:$0 sps:$4 sm:$0x33]   ;;  %vm361_vm0 = vcmask 1041408   ;;  %v822_v1 = vld [vmem:[%s1146_s1 + $0x8] sm:$0xff]   ;;  %v823_v3 = vld [vmem:[%s1146_s1] sm:$0xff]   ;;  %p841_p11 = scmp.ne.s32.totalorder %s1097_s20, %s840_s27 }
  0x14   : > { %778 = vmatprep.subr.msk.bf16.mxu0 %vm361_vm0, %v821_v0  ;;  %779 = vmatprep.subr.msk.bf16.mxu1 %vm361_vm0, %v821_v0  ;;  %v363_v2 = vsel %vm361_vm0, %v821_v0, 0  ;;  %s1156_s28 = smov (!%p166_p10, %s671_s28), 63  ;;  %vm312_vm1 = vcmask 293888   ;;  %v1024_v20 = vld [vmem:[%s1147_s2] ss:$0 sm:$0xff] }
  0x15   : > { %735 = vmatpush3.bf16.msra.mxu0 %v363_v2  ;;  %775 = vmatpush3.bf16.msra.mxu1 %v363_v2  ;;  %s672_s4 = sshll.u32 %s1156_s28, 2  ;;  %p842_p12 = pnand %p841_p11, %p963_p5 }
  0x16   : > { %736 = vmatprep.subr.bf16.mxu0 %v822_v1  ;;  %773 = vmatprep.subr.bf16.mxu1 %v822_v1  ;;  %s986_s7 = scalar_lea.vmem %s1145_s0, %s672_s4  ;;  %s902_s28 = smov [#allocation2]  }
  0x17   : > { %v824_v4 = vld [vmem:[%s986_s7] sm:$0xff]   ;;  %v826_v6 = vld [vmem:[%s986_s7 + $0x8] sm:$0xff]   ;;  %v828_v8 = vld [vmem:[%s986_s7 + $0x10] sm:$0xff]   ;;  %p843_p13 = pneg %p842_p12  ;;  %s844_s29 = sshll.u32 %s902_s28, 4  ;;  %s845_s29 = int_to_ptr.vmem [resolvable:$false] %s844_s29 }
  0x18   : > { %v825_v5 = vld [vmem:[%s986_s7 + $0x40] sm:$0xff]   ;;  %740 = vmatprep.mubr.msk.bf16.mxu0 %vm312_vm1, %v824_v4  ;;  %v827_v7 = vld [vmem:[%s986_s7 + $0x48] sm:$0xff]   ;;  %v829_v9 = vld [vmem:[%s986_s7 + $0x50] sm:$0xff]   ;;  %s846_s30 = scalar_lea.vmem %s845_s29, 8192  ;;  %p847_p0 = scmp.lt.s32.totalorder %s1097_s20, %s845_s29 }
  0x19   : > { %737 = vmatpush3.bf16.msra.mxu0 %v822_v1  ;;  %776 = vmatpush3.bf16.msra.mxu1 %v822_v1  ;;  %v830_v10 = vld [vmem:[%s986_s7 + $0x18] sm:$0xff]   ;;  %v832_v12 = vld [vmem:[%s986_s7 + $0x20] sm:$0xff]   ;;  %v834_v14 = vld [vmem:[%s986_s7 + $0x28] sm:$0xff]   ;;  %p848_p1 = scmp.lt.s32.totalorder %s846_s30, %s840_s27 }
  0x1a   : > { %738 = vmatprep.subr.bf16.mxu0 %v823_v3  ;;  %774 = vmatprep.subr.bf16.mxu1 %v823_v3  ;;  %v831_v11 = vld [vmem:[%s986_s7 + $0x58] sm:$0xff]   ;;  %v833_v13 = vld [vmem:[%s986_s7 + $0x60] sm:$0xff]   ;;  %v835_v15 = vld [vmem:[%s986_s7 + $0x68] sm:$0xff]  }
  0x1b   : > { %756 = vmatprep.mubr.msk.bf16.mxu1 %vm312_vm1, %v825_v5  ;;  %v836_v16 = vld [vmem:[%s986_s7 + $0x30] sm:$0xff]   ;;  %v838_v18 = vld [vmem:[%s986_s7 + $0x38] sm:$0xff]   ;;  %p849_p2 = por %p848_p1, %p847_p0 }
  0x1c   : > { %v837_v17 = vld [vmem:[%s986_s7 + $0x70] sm:$0xff]   ;;  %v839_v19 = vld [vmem:[%s986_s7 + $0x78] sm:$0xff]  }
  0x1d   : > { %739 = vmatpush3.bf16.msra.mxu0 %v823_v3  ;;  %777 = vmatpush3.bf16.msra.mxu1 %v823_v3  ;;  %p850_p3 = pnand %p849_p2, %p843_p13 }
  0x20   : > { %741 = vmatmul.mubr.msk.bf16.vlgmr.msra.gmra.mxu0 %vm312_vm1, %v826_v6  ;;  %757 = vmatmul.mubr.msk.bf16.vlgmr.msra.gmra.mxu1 %vm312_vm1, %v827_v7 }
  0x21   : > { %744 = vmatprep.mubr.msk.bf16.mxu0 %vm312_vm1, %v828_v8  ;;  %760 = vmatprep.mubr.msk.bf16.mxu1 %vm312_vm1, %v829_v9 }
  0x28   : > { %745 = vmatmul.mubr.msk.bf16.gmra.mxu0 %vm312_vm1, %v830_v10  ;;  %761 = vmatmul.mubr.msk.bf16.gmra.mxu1 %vm312_vm1, %v831_v11 }
  0x29   : > { %748 = vmatprep.mubr.msk.bf16.mxu0 %vm312_vm1, %v832_v12  ;;  %764 = vmatprep.mubr.msk.bf16.mxu1 %vm312_vm1, %v833_v13 }
  0x30   : > { %749 = vmatmul.mubr.msk.bf16.gmra.mxu0 %vm312_vm1, %v834_v14  ;;  %765 = vmatmul.mubr.msk.bf16.gmra.mxu1 %vm312_vm1, %v835_v15 }
  0x31   : > { %752 = vmatprep.mubr.msk.bf16.mxu0 %vm312_vm1, %v836_v16  ;;  %768 = vmatprep.mubr.msk.bf16.mxu1 %vm312_vm1, %v837_v17 }
  0x38   : > { %753 = vmatmul.mubr.msk.bf16.gmra.mxu0 %vm312_vm1, %v838_v18  ;;  %769 = vmatmul.mubr.msk.bf16.gmra.mxu1 %vm312_vm1, %v839_v19 }
  0xe0   : > { %v742_v21 = vpop.f32.mrf.mxu0  ;;  %v758_v22 = vpop.f32.mrf.mxu1 }
  0xe1   : > { %v408_v23 = vadd.f32 %v742_v21, %v1024_v20  ;;  %v472_v24 = vadd.f32 %v758_v22, %v1024_v20 }
  0xe2   : > { %v399_v25 = vpop.f32.mrf.mxu0  ;;  %v463_v26 = vpop.f32.mrf.mxu1 }
  0xe3   : > { %v528_v27 = vmax.f32 %v408_v23, 0.0  ;;  %v544_v28 = vmax.f32 %v472_v24, 0.0  ;;  %v400_v29 = vadd.f32 %v1024_v20, %v399_v25  ;;  %v464_v30 = vadd.f32 %v1024_v20, %v463_v26 }
  0xe4   : > { %v743_v31 = vpop.f32.mrf.mxu0  ;;  %v759_v32 = vpop.f32.mrf.mxu1 }
  0xe5   : > { %560 = vst [vmem:[%s1032_s17 + $0x10] sm:$0xff] %v528_v27  ;;  %576 = vst [vmem:[%s1032_s17 + $0x90] sm:$0xff] %v544_v28  ;;  %v526_v33 = vmax.f32 %v400_v29, 0.0  ;;  %v542_v34 = vmax.f32 %v464_v30, 0.0  ;;  %v411_v35 = vadd.f32 %v743_v31, %v1024_v20  ;;  %v475_v36 = vadd.f32 %v759_v32, %v1024_v20 }
  0xe6   : > { %v402_v37 = vpop.f32.mrf.mxu0  ;;  %v466_v38 = vpop.f32.mrf.mxu1 }
  0xe7   : > { %558 = vst [vmem:[%s1032_s17] sm:$0xff] %v526_v33  ;;  %574 = vst [vmem:[%s1032_s17 + $0x80] sm:$0xff] %v542_v34  ;;  %v529_v39 = vmax.f32 %v411_v35, 0.0  ;;  %v545_v40 = vmax.f32 %v475_v36, 0.0  ;;  %v403_v41 = vadd.f32 %v1024_v20, %v402_v37  ;;  %v467_v42 = vadd.f32 %v1024_v20, %v466_v38 }
  0xe8   : > { %v746_v43 = vpop.f32.mrf.mxu0  ;;  %v762_v44 = vpop.f32.mrf.mxu1 }
  0xe9   : > { %561 = vst [vmem:[%s1032_s17 + $0x18] sm:$0xff] %v529_v39  ;;  %577 = vst [vmem:[%s1032_s17 + $0x98] sm:$0xff] %v545_v40  ;;  %v527_v45 = vmax.f32 %v403_v41, 0.0  ;;  %v543_v46 = vmax.f32 %v467_v42, 0.0  ;;  %v424_v47 = vadd.f32 %v746_v43, %v1024_v20  ;;  %v488_v48 = vadd.f32 %v762_v44, %v1024_v20 }
  0xea   : > { %v415_v49 = vpop.f32.mrf.mxu0  ;;  %v479_v50 = vpop.f32.mrf.mxu1 }
  0xeb   : > { %559 = vst [vmem:[%s1032_s17 + $0x8] sm:$0xff] %v527_v45  ;;  %575 = vst [vmem:[%s1032_s17 + $0x88] sm:$0xff] %v543_v46  ;;  %v532_v51 = vmax.f32 %v424_v47, 0.0  ;;  %v548_v52 = vmax.f32 %v488_v48, 0.0  ;;  %v416_v53 = vadd.f32 %v1024_v20, %v415_v49  ;;  %v480_v54 = vadd.f32 %v1024_v20, %v479_v50 }
  0xec   : > { %v747_v55 = vpop.f32.mrf.mxu0  ;;  %v763_v56 = vpop.f32.mrf.mxu1 }
  0xed   : > { %564 = vst [vmem:[%s1032_s17 + $0x30] sm:$0xff] %v532_v51  ;;  %580 = vst [vmem:[%s1032_s17 + $0xb0] sm:$0xff] %v548_v52  ;;  %v530_v57 = vmax.f32 %v416_v53, 0.0  ;;  %v546_v58 = vmax.f32 %v480_v54, 0.0  ;;  %v427_v59 = vadd.f32 %v747_v55, %v1024_v20  ;;  %v491_v60 = vadd.f32 %v763_v56, %v1024_v20 }
  0xee   : > { %v418_v61 = vpop.f32.mrf.mxu0  ;;  %v482_v62 = vpop.f32.mrf.mxu1 }
  0xef   : > { %562 = vst [vmem:[%s1032_s17 + $0x20] sm:$0xff] %v530_v57  ;;  %578 = vst [vmem:[%s1032_s17 + $0xa0] sm:$0xff] %v546_v58  ;;  %v533_v63 = vmax.f32 %v427_v59, 0.0  ;;  %v549_v0 = vmax.f32 %v491_v60, 0.0  ;;  %v419_v1 = vadd.f32 %v1024_v20, %v418_v61  ;;  %v483_v2 = vadd.f32 %v1024_v20, %v482_v62 }
  0xf0   : > { %v750_v3 = vpop.f32.mrf.mxu0  ;;  %v766_v4 = vpop.f32.mrf.mxu1 }
  0xf1   : > { %565 = vst [vmem:[%s1032_s17 + $0x38] sm:$0xff] %v533_v63  ;;  %581 = vst [vmem:[%s1032_s17 + $0xb8] sm:$0xff] %v549_v0  ;;  %v531_v5 = vmax.f32 %v419_v1, 0.0  ;;  %v547_v6 = vmax.f32 %v483_v2, 0.0  ;;  %v440_v7 = vadd.f32 %v750_v3, %v1024_v20  ;;  %v504_v8 = vadd.f32 %v766_v4, %v1024_v20 }
  0xf2   : > { %v431_v9 = vpop.f32.mrf.mxu0  ;;  %v495_v10 = vpop.f32.mrf.mxu1 }
  0xf3   : > { %563 = vst [vmem:[%s1032_s17 + $0x28] sm:$0xff] %v531_v5  ;;  %579 = vst [vmem:[%s1032_s17 + $0xa8] sm:$0xff] %v547_v6  ;;  %v536_v11 = vmax.f32 %v440_v7, 0.0  ;;  %v552_v12 = vmax.f32 %v504_v8, 0.0  ;;  %v432_v13 = vadd.f32 %v1024_v20, %v431_v9  ;;  %v496_v14 = vadd.f32 %v1024_v20, %v495_v10 }
  0xf4   : > { %v751_v15 = vpop.f32.mrf.mxu0  ;;  %v767_v16 = vpop.f32.mrf.mxu1 }
  0xf5   : > { %568 = vst [vmem:[%s1032_s17 + $0x50] sm:$0xff] %v536_v11  ;;  %584 = vst [vmem:[%s1032_s17 + $0xd0] sm:$0xff] %v552_v12  ;;  %v534_v17 = vmax.f32 %v432_v13, 0.0  ;;  %v550_v18 = vmax.f32 %v496_v14, 0.0  ;;  %v443_v19 = vadd.f32 %v751_v15, %v1024_v20  ;;  %v507_v21 = vadd.f32 %v767_v16, %v1024_v20 }
  0xf6   : > { %v434_v22 = vpop.f32.mrf.mxu0  ;;  %v498_v23 = vpop.f32.mrf.mxu1 }
  0xf7   : > { %566 = vst [vmem:[%s1032_s17 + $0x40] sm:$0xff] %v534_v17  ;;  %582 = vst [vmem:[%s1032_s17 + $0xc0] sm:$0xff] %v550_v18  ;;  %v537_v24 = vmax.f32 %v443_v19, 0.0  ;;  %v553_v25 = vmax.f32 %v507_v21, 0.0  ;;  %v435_v26 = vadd.f32 %v1024_v20, %v434_v22  ;;  %v499_v27 = vadd.f32 %v1024_v20, %v498_v23 }
  0xf8   : > { %v754_v28 = vpop.f32.mrf.mxu0  ;;  %v770_v29 = vpop.f32.mrf.mxu1 }
  0xf9   : > { %569 = vst [vmem:[%s1032_s17 + $0x58] sm:$0xff] %v537_v24  ;;  %585 = vst [vmem:[%s1032_s17 + $0xd8] sm:$0xff] %v553_v25  ;;  %v535_v30 = vmax.f32 %v435_v26, 0.0  ;;  %v551_v31 = vmax.f32 %v499_v27, 0.0  ;;  %v456_v32 = vadd.f32 %v754_v28, %v1024_v20  ;;  %v520_v33 = vadd.f32 %v770_v29, %v1024_v20 }
  0xfa   : > { %v447_v34 = vpop.f32.mrf.mxu0  ;;  %v511_v35 = vpop.f32.mrf.mxu1 }
  0xfb   : > { %567 = vst [vmem:[%s1032_s17 + $0x48] sm:$0xff] %v535_v30  ;;  %583 = vst [vmem:[%s1032_s17 + $0xc8] sm:$0xff] %v551_v31  ;;  %v540_v36 = vmax.f32 %v456_v32, 0.0  ;;  %v556_v37 = vmax.f32 %v520_v33, 0.0  ;;  %v448_v38 = vadd.f32 %v1024_v20, %v447_v34  ;;  %v512_v39 = vadd.f32 %v1024_v20, %v511_v35 }
  0xfc   : > { %v755_v40 = vpop.f32.mrf.mxu0  ;;  %v771_v41 = vpop.f32.mrf.mxu1 }
  0xfd   : > { %572 = vst [vmem:[%s1032_s17 + $0x70] sm:$0xff] %v540_v36  ;;  %588 = vst [vmem:[%s1032_s17 + $0xf0] sm:$0xff] %v556_v37  ;;  %v538_v42 = vmax.f32 %v448_v38, 0.0  ;;  %v554_v43 = vmax.f32 %v512_v39, 0.0  ;;  %v459_v44 = vadd.f32 %v755_v40, %v1024_v20  ;;  %v523_v45 = vadd.f32 %v771_v41, %v1024_v20 }
  0xfe   : > { %v450_v46 = vpop.f32.mrf.mxu0  ;;  %v514_v47 = vpop.f32.mrf.mxu1 }
  0xff   : > { %570 = vst [vmem:[%s1032_s17 + $0x60] sm:$0xff] %v538_v42  ;;  %586 = vst [vmem:[%s1032_s17 + $0xe0] sm:$0xff] %v554_v43  ;;  %v541_v48 = vmax.f32 %v459_v44, 0.0  ;;  %v557_v49 = vmax.f32 %v523_v45, 0.0  ;;  %v451_v50 = vadd.f32 %v1024_v20, %v450_v46  ;;  %v515_v51 = vadd.f32 %v1024_v20, %v514_v47 }
 0x101   : > { %573 = vst [vmem:[%s1032_s17 + $0x78] sm:$0xff] %v541_v48  ;;  %589 = vst [vmem:[%s1032_s17 + $0xf8] sm:$0xff] %v557_v49  ;;  %v539_v52 = vmax.f32 %v451_v50, 0.0  ;;  %v555_v53 = vmax.f32 %v515_v51, 0.0 }
 0x103   : > { %571 = vst [vmem:[%s1032_s17 + $0x68] sm:$0xff] %v539_v52  ;;  %587 = vst [vmem:[%s1032_s17 + $0xe8] sm:$0xff] %v555_v53 }
 0x104   : > { %853 = shalt.err (!%p850_p3)
}
 0x105   : > { %s854_s4 = scalar_lea.hbm %s1095_s26, 4096  ;;  %s858_s7 = scalar_lea.hbm %s1148_s3, 8192 }
 0x106   : > { %p855_p4 = scmp.ne.s32.totalorder %s1095_s26, %s854_s4  ;;  %p859_p9 = scmp.lt.s32.totalorder %s1095_s26, %s1148_s3 }
 0x107   : > { %p860_p10 = scmp.lt.s32.totalorder %s858_s7, %s854_s4 }
 0x108   : > { %p856_p7 = pnand %p855_p4, %p963_p5 }
 0x109   : > { %p861_p11 = por %p860_p10, %p859_p9 }
 0x10a   : > { %p857_p8 = pneg %p856_p7 }
 0x10c   : > { %p862_p12 = pnand %p861_p11, %p857_p8 }
 0x10e   : > { %865 = shalt.err (!%p862_p12)
}
 0x10f   : > { %s903_s10 = smov 128   ;;  %s904_s11 = smov 8  }
 0x110   : > { %780 = dma.vmem_to_hbm [thread:$0]  (%p963_p5), %s1097_s20, 4096, %s1095_s26, %s1105_s16, %s903_s10, %s903_s10, %s904_s11  }
 0x111 PF: > { %p786_p13 = scmp.ge.s32.totalorder %s900_s15, 2  ;;  %s619_s17 = sand.u32 1, %s888_s12  }
 0x112   : > { %s620_s19 = scalar_lea.sflag [#allocation3], %s619_s17 }
 0x113   : > { %p783_p0 = pnand %p786_p13, %p967_p6 }
 0x115   : > { %p784_p1 = pneg %p783_p0 }
 0x117   : > { %883 = dma.done.wait (%p784_p1), %s620_s19, 4096  }
 0x118   : > { %885 = vsyncadd (%p784_p1), %s620_s19, 4294963200  ;;  %p13_p2 = scmp.ge.s32.totalorder %s950_s18, 4   ;;  %s1151_s12 = smov %s892_s13 }
 0x119   : > { %s1152_s13 = smov %s896_s14  ;;  %s1153_s14 = smov %s961_s21 }
 0x11a   : > { %s1154_s15 = smov %s950_s18  ;;  %15 = sbr.rel (!%p13_p2) target bundleno = 3 (0x3), region = 67 }
 0x11f   :  { %625 = vsyncpa [#allocation3], 1 }
 0x120   :  { %627 = vsyncpa [#allocation3 + $0x1], 1 }

</bundles_post_ra>
